<compile_context>
chip_gen: v5e
topology: v5e:2x2
jax: 0.10.0
libtpu: 0.0.40
codegen_flags: <defaults>
</compile_context>

<pallas_src>
import functools

import jax
import jax.numpy as jnp
from jax.experimental import pallas as pl
from jax.experimental.pallas import tpu as pltpu


def _wce_partials_kernel(x_ref, t_ref, p_ref, nll_ref, cnt_ref, *,
                         rows_tile, hw, ignore_index, has_tail):
    """Accumulate per-image, per-class partial sums.

    x_ref  : (1, C, rows_tile, 128) logits tile (native dtype)
    t_ref  : (1, 1, rows_tile, 128) int32 targets tile
    p_ref  : (1, C, 128) f32  -- sum over pixels of softmax prob per class
    nll_ref: (1, C, 128) f32  -- sum over valid target pixels of -log softmax
    cnt_ref: (1, C, 128) f32  -- number of valid target pixels per class
    """
    s = pl.program_id(1)
    n_s = pl.num_programs(1)

    @pl.when(s == 0)
    def _():
        p_ref[...] = jnp.zeros_like(p_ref)
        nll_ref[...] = jnp.zeros_like(nll_ref)
        cnt_ref[...] = jnp.zeros_like(cnt_ref)

    def accumulate(masked):
        x = x_ref[0].astype(jnp.float32)            # (C, rows, 128)
        t = t_ref[0, 0]                             # (rows, 128) int32
        C, rows, lanes = x.shape

        # Per-class full-occupancy slabs (static slices of the leading dim).
        xs = [x[c] for c in range(C)]               # C x (rows, 128)

        # Softmax along the class axis as C-way elementwise ops on full vregs.
        m = xs[0]
        for c in range(1, C):
            m = jnp.maximum(m, xs[c])
        xms = [xc - m for xc in xs]
        es = [jnp.exp(xmc) for xmc in xms]
        se = es[0]
        for c in range(1, C):
            se = se + es[c]
        rinv = 1.0 / se                             # (rows, 128)
        lse = jnp.log(se)                           # -log softmax = lse - xm

        valid = t != ignore_index                   # (rows, 128)
        in_bounds = None
        if masked:
            # Real pixels have flat spatial index < HW.  Covers both the
            # 128-lane padding and Pallas' out-of-bounds rows in the last
            # block; selects quarantine any Inf/NaN from garbage data.
            row = jax.lax.broadcasted_iota(jnp.int32, (rows, lanes), 0)
            lane = jax.lax.broadcasted_iota(jnp.int32, (rows, lanes), 1)
            in_bounds = (s * rows_tile + row) * 128 + lane < hw
            valid = jnp.logical_and(valid, in_bounds)

        # Per-tile reductions into tiny (C, 128) lane-dense partials.
        # (C is small and static; the Python loop is unrolled at trace time.)
        p_rows, nll_rows, cnt_rows = [], [], []
        for c in range(C):
            p_c = es[c] * rinv                                     # (rows,128)
            if masked:
                p_c = jnp.where(in_bounds, p_c, 0.0)
            p_rows.append(jnp.sum(p_c, axis=0, keepdims=True))     # (1,128)

            pick_c = jnp.logical_and(t == c, valid)                # (rows,128)
            nll_rows.append(jnp.sum(jnp.where(pick_c, lse - xms[c], 0.0),
                                    axis=0, keepdims=True))        # (1,128)
            cnt_rows.append(jnp.sum(jnp.where(pick_c, 1.0, 0.0),
                                    axis=0, keepdims=True))        # (1,128)

        p_ref[...] += jnp.concatenate(p_rows, axis=0)[None]        # (1,C,128)
        nll_ref[...] += jnp.concatenate(nll_rows, axis=0)[None]
        cnt_ref[...] += jnp.concatenate(cnt_rows, axis=0)[None]

    if has_tail:
        # Masked path only on the last spatial block; steady state is unmasked.
        @pl.when(s == n_s - 1)
        def _():
            accumulate(True)

        @pl.when(s != n_s - 1)
        def _():
            accumulate(False)
    else:
        accumulate(False)


def _choose_rows_tile(n_rows, c, target_f32_bytes=1 << 20):
    """Row tile: multiple of 8 (or the full extent) so that one (C, rows, 128)
    f32 slab is ~1 MiB.  Conservative enough for v7x's 64 MiB VMEM once slab
    temporaries are counted; v5e/v6e (128 MiB) could go 2-4x bigger."""
    rows = target_f32_bytes // (c * 128 * 4)
    rows = max(8, (rows // 8) * 8)
    if n_rows <= rows:
        return n_rows, 1
    return rows, pl.cdiv(n_rows, rows)


def weighted_cross_entropy_loss(logits_nchw, target_nhw, ignore_index=-1):
    """Matches WeightedCrossEntropyLoss().forward(input, target) in PyTorch."""
    N, C, H, W = logits_nchw.shape
    HW = H * W
    R = pl.cdiv(HW, 128)

    x = logits_nchw.reshape(N, C, HW)
    t = target_nhw.reshape(N, HW).astype(jnp.int32)
    if HW != R * 128:
        # Uncommon remainder case: pad the spatial axis to a lane multiple
        # (one XLA pad copy); padded pixels are excluded in-kernel by the mask.
        pad = R * 128 - HW
        x = jnp.pad(x, ((0, 0), (0, 0), (0, pad)))
        t = jnp.pad(t, ((0, 0), (0, pad)), constant_values=ignore_index)
    x = x.reshape(N, C, R, 128)         # free view when HW % 128 == 0
    t = t.reshape(N, 1, R, 128)

    rows_tile, grid_s = _choose_rows_tile(R, C)
    has_tail = (grid_s * rows_tile * 128) != HW

    # Explicit VMEM budget: double-buffered inputs + generous slab-temporary
    # count + double-buffered output partials + margin.
    itemsize = jnp.dtype(x.dtype).itemsize
    f32_slab = C * rows_tile * 128 * 4
    in_tiles = 2 * (C * rows_tile * 128 * itemsize + rows_tile * 128 * 4)
    out_blks = 3 * 2 * C * 128 * 4
    vmem_limit = int(min(max(in_tiles + 16 * f32_slab + out_blks + (4 << 20),
                             32 << 20), 60 << 20))

    kernel = functools.partial(
        _wce_partials_kernel, rows_tile=rows_tile, hw=HW,
        ignore_index=ignore_index, has_tail=has_tail)

    part_shape = jax.ShapeDtypeStruct((N, C, 128), jnp.float32)
    part_spec = pl.BlockSpec((1, C, 128), lambda n, s: (n, 0, 0))

    p_part, nll_part, cnt_part = pl.pallas_call(
        kernel,
        out_shape=(part_shape, part_shape, part_shape),
        grid_spec=pltpu.PrefetchScalarGridSpec(
            num_scalar_prefetch=0,
            grid=(N, grid_s),
            in_specs=[
                pl.BlockSpec((1, C, rows_tile, 128), lambda n, s: (n, 0, s, 0)),
                pl.BlockSpec((1, 1, rows_tile, 128), lambda n, s: (n, 0, s, 0)),
            ],
            out_specs=(part_spec, part_spec, part_spec),
        ),
        compiler_params=pltpu.CompilerParams(
            dimension_semantics=("parallel", "arbitrary"),
            vmem_limit_bytes=vmem_limit),
    )(x, t)

    # Tiny combine epilogue (pure JAX): per-class totals -> weights -> loss.
    p_sum = jnp.sum(p_part, axis=(0, 2))    # sum_m softmax[m, c]
    nll = jnp.sum(nll_part, axis=(0, 2))    # sum over picked pixels of -log p
    cnt = jnp.sum(cnt_part, axis=(0, 2))    # picked-pixel counts
    w = (jnp.float32(N * HW) - p_sum) / p_sum
    return jnp.sum(w * nll) / jnp.sum(w * cnt)


def _reference(logits, target, ignore_index=-1):
    """Pure-JAX reference mirroring the PyTorch module."""
    p = jax.nn.softmax(logits, axis=1)
    C = logits.shape[1]
    flat = jnp.transpose(p, (1, 0, 2, 3)).reshape(C, -1)
    w = (1.0 - flat).sum(-1) / flat.sum(-1)
    logp = jax.nn.log_softmax(logits, axis=1)
    valid = target != ignore_index
    t_safe = jnp.where(valid, target, 0)
    picked = jnp.take_along_axis(logp, t_safe[:, None], axis=1)[:, 0]
    wt = w[t_safe]
    num = jnp.sum(jnp.where(valid, -picked * wt, 0.0))
    den = jnp.sum(jnp.where(valid, wt, 0.0))
    return num / den


if __name__ == "__main__":
    key = jax.random.PRNGKey(0)
    k1, k2 = jax.random.split(key)

    N, C, H, W = 2, 4, 16, 16
    logits = jax.random.normal(k1, (N, C, H, W), dtype=jnp.float32)
    target = jax.random.randint(k2, (N, H, W), 0, C, dtype=jnp.int32)
    # exercise ignore_index on a few pixels
    target = target.at[0, 0, :4].set(-1)

    loss = jax.block_until_ready(
        weighted_cross_entropy_loss(logits, target, ignore_index=-1))
    ref = jax.block_until_ready(_reference(logits, target, ignore_index=-1))
    assert jnp.allclose(loss, ref, rtol=1e-5, atol=1e-5), (loss, ref)

    print("KERNEL_OK")
</pallas_src>

<mosaic_0001>
module attributes {stable_mosaic.version = 11 : i64} {
  func.func @_wce_partials_kernel(%arg0: i32, %arg1: i32, %arg2: memref<1x4x2x128xf32, #tpu.memory_space<vmem>>, %arg3: memref<1x1x2x128xi32, #tpu.memory_space<vmem>>, %arg4: memref<1x4x128xf32, #tpu.memory_space<vmem>>, %arg5: memref<1x4x128xf32, #tpu.memory_space<vmem>>, %arg6: memref<1x4x128xf32, #tpu.memory_space<vmem>>) attributes {dimension_semantics = [#tpu.dimension_semantics<parallel>, #tpu.dimension_semantics<arbitrary>], iteration_bounds = array<i64: 2, 1>, scalar_prefetch = 0 : i64, scratch_operands = 0 : i64, tpu.core_type = #tpu.core_type<tc>, window_params = [{transform_indices = @transform_0, window_bounds = array<i64: 1, 4, 2, 128>}, {transform_indices = @transform_1, window_bounds = array<i64: 1, 1, 2, 128>}, {transform_indices = @transform_2, window_bounds = array<i64: 1, 4, 128>}, {transform_indices = @transform_3, window_bounds = array<i64: 1, 4, 128>}, {transform_indices = @transform_4, window_bounds = array<i64: 1, 4, 128>}]} {
    %c0_i32 = arith.constant 0 : i32
    %0 = arith.cmpi eq, %arg1, %c0_i32 : i32
    %1 = arith.extui %0 : i1 to i32
    %c0_i32_0 = arith.constant 0 : i32
    %2 = arith.cmpi ne, %1, %c0_i32_0 : i32
    scf.if %2 {
      %cst_51 = arith.constant 0.000000e+00 : f32
      %113 = vector.broadcast %cst_51 : f32 to vector<1x4x128xf32>
      %c0_52 = arith.constant 0 : index
      %c0_53 = arith.constant 0 : index
      %c0_54 = arith.constant 0 : index
      %114 = vector.load %arg4[%c0_52, %c0_53, %c0_54] : memref<1x4x128xf32, #tpu.memory_space<vmem>>, vector<1x4x128xf32>
      tpu.vector_store %arg4[%c0_52, %c0_53, %c0_54], %113 {strides = array<i32>} : memref<1x4x128xf32, #tpu.memory_space<vmem>>, vector<1x4x128xf32>,
      %cst_55 = arith.constant 0.000000e+00 : f32
      %115 = vector.broadcast %cst_55 : f32 to vector<1x4x128xf32>
      %c0_56 = arith.constant 0 : index
      %c0_57 = arith.constant 0 : index
      %c0_58 = arith.constant 0 : index
      %116 = vector.load %arg5[%c0_56, %c0_57, %c0_58] : memref<1x4x128xf32, #tpu.memory_space<vmem>>, vector<1x4x128xf32>
      tpu.vector_store %arg5[%c0_56, %c0_57, %c0_58], %115 {strides = array<i32>} : memref<1x4x128xf32, #tpu.memory_space<vmem>>, vector<1x4x128xf32>,
      %cst_59 = arith.constant 0.000000e+00 : f32
      %117 = vector.broadcast %cst_59 : f32 to vector<1x4x128xf32>
      %c0_60 = arith.constant 0 : index
      %c0_61 = arith.constant 0 : index
      %c0_62 = arith.constant 0 : index
      %118 = vector.load %arg6[%c0_60, %c0_61, %c0_62] : memref<1x4x128xf32, #tpu.memory_space<vmem>>, vector<1x4x128xf32>
      tpu.vector_store %arg6[%c0_60, %c0_61, %c0_62], %117 {strides = array<i32>} : memref<1x4x128xf32, #tpu.memory_space<vmem>>, vector<1x4x128xf32>,
    } else {
    }
    %c0 = arith.constant 0 : index
    %c0_1 = arith.constant 0 : index
    %c0_2 = arith.constant 0 : index
    %c0_3 = arith.constant 0 : index
    %3 = vector.load %arg2[%c0, %c0_1, %c0_2, %c0_3] : memref<1x4x2x128xf32, #tpu.memory_space<vmem>>, vector<1x4x2x128xf32>
    %4 = vector.shape_cast %3 : vector<1x4x2x128xf32> to vector<4x2x128xf32>
    %c0_4 = arith.constant 0 : index
    %c0_5 = arith.constant 0 : index
    %c0_6 = arith.constant 0 : index
    %c0_7 = arith.constant 0 : index
    %5 = vector.load %arg3[%c0_4, %c0_5, %c0_6, %c0_7] : memref<1x1x2x128xi32, #tpu.memory_space<vmem>>, vector<1x1x2x128xi32>
    %6 = vector.shape_cast %5 : vector<1x1x2x128xi32> to vector<2x128xi32>
    %7 = vector.extract_strided_slice %4 {offsets = [0, 0, 0], sizes = [1, 2, 128], strides = [1, 1, 1]} : vector<4x2x128xf32> to vector<1x2x128xf32>
    %8 = vector.shape_cast %7 : vector<1x2x128xf32> to vector<2x128xf32>
    %9 = vector.extract_strided_slice %4 {offsets = [1, 0, 0], sizes = [1, 2, 128], strides = [1, 1, 1]} : vector<4x2x128xf32> to vector<1x2x128xf32>
    %10 = vector.shape_cast %9 : vector<1x2x128xf32> to vector<2x128xf32>
    %11 = vector.extract_strided_slice %4 {offsets = [2, 0, 0], sizes = [1, 2, 128], strides = [1, 1, 1]} : vector<4x2x128xf32> to vector<1x2x128xf32>
    %12 = vector.shape_cast %11 : vector<1x2x128xf32> to vector<2x128xf32>
    %13 = vector.extract_strided_slice %4 {offsets = [3, 0, 0], sizes = [1, 2, 128], strides = [1, 1, 1]} : vector<4x2x128xf32> to vector<1x2x128xf32>
    %14 = vector.shape_cast %13 : vector<1x2x128xf32> to vector<2x128xf32>
    %15 = arith.maximumf %8, %10 : vector<2x128xf32>
    %16 = arith.maximumf %15, %12 : vector<2x128xf32>
    %17 = arith.maximumf %16, %14 : vector<2x128xf32>
    %18 = arith.subf %8, %17 : vector<2x128xf32>
    %19 = arith.subf %10, %17 : vector<2x128xf32>
    %20 = arith.subf %12, %17 : vector<2x128xf32>
    %21 = arith.subf %14, %17 : vector<2x128xf32>
    %22 = math.exp %18 : vector<2x128xf32>
    %23 = math.exp %19 : vector<2x128xf32>
    %24 = math.exp %20 : vector<2x128xf32>
    %25 = math.exp %21 : vector<2x128xf32>
    %26 = arith.addf %22, %23 : vector<2x128xf32>
    %27 = arith.addf %26, %24 : vector<2x128xf32>
    %28 = arith.addf %27, %25 : vector<2x128xf32>
    %cst = arith.constant 1.000000e+00 : f32
    %29 = vector.broadcast %cst : f32 to vector<2x128xf32>
    %30 = arith.divf %29, %28 : vector<2x128xf32>
    %31 = math.log %28 : vector<2x128xf32>
    %c-1_i32 = arith.constant -1 : i32
    %32 = vector.broadcast %c-1_i32 : i32 to vector<2x128xi32>
    %33 = arith.cmpi ne, %6, %32 : vector<2x128xi32>
    %34 = arith.mulf %22, %30 : vector<2x128xf32>
    %cst_8 = arith.constant dense<0.000000e+00> : vector<128xf32>
    %35 = vector.multi_reduction <add>, %34, %cst_8 [0] : vector<2x128xf32> to vector<128xf32>
    %36 = vector.shape_cast %35 : vector<128xf32> to vector<1x128xf32>
    %c0_i32_9 = arith.constant 0 : i32
    %37 = vector.broadcast %c0_i32_9 : i32 to vector<2x128xi32>
    %38 = arith.cmpi eq, %6, %37 : vector<2x128xi32>
    %39 = arith.andi %38, %33 : vector<2x128xi1>
    %40 = arith.subf %31, %18 : vector<2x128xf32>
    %cst_10 = arith.constant 0.000000e+00 : f32
    %41 = vector.broadcast %cst_10 : f32 to vector<2x128xf32>
    %42 = arith.select %39, %40, %41 : vector<2x128xi1>, vector<2x128xf32>
    %cst_11 = arith.constant dense<0.000000e+00> : vector<128xf32>
    %43 = vector.multi_reduction <add>, %42, %cst_11 [0] : vector<2x128xf32> to vector<128xf32>
    %44 = vector.shape_cast %43 : vector<128xf32> to vector<1x128xf32>
    %cst_12 = arith.constant 1.000000e+00 : f32
    %cst_13 = arith.constant 0.000000e+00 : f32
    %45 = vector.broadcast %cst_12 : f32 to vector<2x128xf32>
    %46 = vector.broadcast %cst_13 : f32 to vector<2x128xf32>
    %47 = arith.select %39, %45, %46 : vector<2x128xi1>, vector<2x128xf32>
    %cst_14 = arith.constant dense<0.000000e+00> : vector<128xf32>
    %48 = vector.multi_reduction <add>, %47, %cst_14 [0] : vector<2x128xf32> to vector<128xf32>
    %49 = vector.shape_cast %48 : vector<128xf32> to vector<1x128xf32>
    %50 = arith.mulf %23, %30 : vector<2x128xf32>
    %cst_15 = arith.constant dense<0.000000e+00> : vector<128xf32>
    %51 = vector.multi_reduction <add>, %50, %cst_15 [0] : vector<2x128xf32> to vector<128xf32>
    %52 = vector.shape_cast %51 : vector<128xf32> to vector<1x128xf32>
    %c1_i32 = arith.constant 1 : i32
    %53 = vector.broadcast %c1_i32 : i32 to vector<2x128xi32>
    %54 = arith.cmpi eq, %6, %53 : vector<2x128xi32>
    %55 = arith.andi %54, %33 : vector<2x128xi1>
    %56 = arith.subf %31, %19 : vector<2x128xf32>
    %cst_16 = arith.constant 0.000000e+00 : f32
    %57 = vector.broadcast %cst_16 : f32 to vector<2x128xf32>
    %58 = arith.select %55, %56, %57 : vector<2x128xi1>, vector<2x128xf32>
    %cst_17 = arith.constant dense<0.000000e+00> : vector<128xf32>
    %59 = vector.multi_reduction <add>, %58, %cst_17 [0] : vector<2x128xf32> to vector<128xf32>
    %60 = vector.shape_cast %59 : vector<128xf32> to vector<1x128xf32>
    %cst_18 = arith.constant 1.000000e+00 : f32
    %cst_19 = arith.constant 0.000000e+00 : f32
    %61 = vector.broadcast %cst_18 : f32 to vector<2x128xf32>
    %62 = vector.broadcast %cst_19 : f32 to vector<2x128xf32>
    %63 = arith.select %55, %61, %62 : vector<2x128xi1>, vector<2x128xf32>
    %cst_20 = arith.constant dense<0.000000e+00> : vector<128xf32>
    %64 = vector.multi_reduction <add>, %63, %cst_20 [0] : vector<2x128xf32> to vector<128xf32>
    %65 = vector.shape_cast %64 : vector<128xf32> to vector<1x128xf32>
    %66 = arith.mulf %24, %30 : vector<2x128xf32>
    %cst_21 = arith.constant dense<0.000000e+00> : vector<128xf32>
    %67 = vector.multi_reduction <add>, %66, %cst_21 [0] : vector<2x128xf32> to vector<128xf32>
    %68 = vector.shape_cast %67 : vector<128xf32> to vector<1x128xf32>
    %c2_i32 = arith.constant 2 : i32
    %69 = vector.broadcast %c2_i32 : i32 to vector<2x128xi32>
    %70 = arith.cmpi eq, %6, %69 : vector<2x128xi32>
    %71 = arith.andi %70, %33 : vector<2x128xi1>
    %72 = arith.subf %31, %20 : vector<2x128xf32>
    %cst_22 = arith.constant 0.000000e+00 : f32
    %73 = vector.broadcast %cst_22 : f32 to vector<2x128xf32>
    %74 = arith.select %71, %72, %73 : vector<2x128xi1>, vector<2x128xf32>
    %cst_23 = arith.constant dense<0.000000e+00> : vector<128xf32>
    %75 = vector.multi_reduction <add>, %74, %cst_23 [0] : vector<2x128xf32> to vector<128xf32>
    %76 = vector.shape_cast %75 : vector<128xf32> to vector<1x128xf32>
    %cst_24 = arith.constant 1.000000e+00 : f32
    %cst_25 = arith.constant 0.000000e+00 : f32
    %77 = vector.broadcast %cst_24 : f32 to vector<2x128xf32>
    %78 = vector.broadcast %cst_25 : f32 to vector<2x128xf32>
    %79 = arith.select %71, %77, %78 : vector<2x128xi1>, vector<2x128xf32>
    %cst_26 = arith.constant dense<0.000000e+00> : vector<128xf32>
    %80 = vector.multi_reduction <add>, %79, %cst_26 [0] : vector<2x128xf32> to vector<128xf32>
    %81 = vector.shape_cast %80 : vector<128xf32> to vector<1x128xf32>
    %82 = arith.mulf %25, %30 : vector<2x128xf32>
    %cst_27 = arith.constant dense<0.000000e+00> : vector<128xf32>
    %83 = vector.multi_reduction <add>, %82, %cst_27 [0] : vector<2x128xf32> to vector<128xf32>
    %84 = vector.shape_cast %83 : vector<128xf32> to vector<1x128xf32>
    %c3_i32 = arith.constant 3 : i32
    %85 = vector.broadcast %c3_i32 : i32 to vector<2x128xi32>
    %86 = arith.cmpi eq, %6, %85 : vector<2x128xi32>
    %87 = arith.andi %86, %33 : vector<2x128xi1>
    %88 = arith.subf %31, %21 : vector<2x128xf32>
    %cst_28 = arith.constant 0.000000e+00 : f32
    %89 = vector.broadcast %cst_28 : f32 to vector<2x128xf32>
    %90 = arith.select %87, %88, %89 : vector<2x128xi1>, vector<2x128xf32>
    %cst_29 = arith.constant dense<0.000000e+00> : vector<128xf32>
    %91 = vector.multi_reduction <add>, %90, %cst_29 [0] : vector<2x128xf32> to vector<128xf32>
    %92 = vector.shape_cast %91 : vector<128xf32> to vector<1x128xf32>
    %cst_30 = arith.constant 1.000000e+00 : f32
    %cst_31 = arith.constant 0.000000e+00 : f32
    %93 = vector.broadcast %cst_30 : f32 to vector<2x128xf32>
    %94 = vector.broadcast %cst_31 : f32 to vector<2x128xf32>
    %95 = arith.select %87, %93, %94 : vector<2x128xi1>, vector<2x128xf32>
    %cst_32 = arith.constant dense<0.000000e+00> : vector<128xf32>
    %96 = vector.multi_reduction <add>, %95, %cst_32 [0] : vector<2x128xf32> to vector<128xf32>
    %97 = vector.shape_cast %96 : vector<128xf32> to vector<1x128xf32>
    %c0_33 = arith.constant 0 : index
    %c0_34 = arith.constant 0 : index
    %c0_35 = arith.constant 0 : index
    %98 = vector.load %arg4[%c0_33, %c0_34, %c0_35] : memref<1x4x128xf32, #tpu.memory_space<vmem>>, vector<1x4x128xf32>
    %99 = tpu.concatenate %36, %52, %68, %84 in 0 : vector<1x128xf32>, vector<1x128xf32>, vector<1x128xf32>, vector<1x128xf32> -> vector<4x128xf32>
    %100 = vector.shape_cast %99 : vector<4x128xf32> to vector<1x4x128xf32>
    %101 = arith.addf %98, %100 : vector<1x4x128xf32>
    %c0_36 = arith.constant 0 : index
    %c0_37 = arith.constant 0 : index
    %c0_38 = arith.constant 0 : index
    %102 = vector.load %arg4[%c0_36, %c0_37, %c0_38] : memref<1x4x128xf32, #tpu.memory_space<vmem>>, vector<1x4x128xf32>
    tpu.vector_store %arg4[%c0_36, %c0_37, %c0_38], %101 {strides = array<i32>} : memref<1x4x128xf32, #tpu.memory_space<vmem>>, vector<1x4x128xf32>,
    %c0_39 = arith.constant 0 : index
    %c0_40 = arith.constant 0 : index
    %c0_41 = arith.constant 0 : index
    %103 = vector.load %arg5[%c0_39, %c0_40, %c0_41] : memref<1x4x128xf32, #tpu.memory_space<vmem>>, vector<1x4x128xf32>
    %104 = tpu.concatenate %44, %60, %76, %92 in 0 : vector<1x128xf32>, vector<1x128xf32>, vector<1x128xf32>, vector<1x128xf32> -> vector<4x128xf32>
    %105 = vector.shape_cast %104 : vector<4x128xf32> to vector<1x4x128xf32>
    %106 = arith.addf %103, %105 : vector<1x4x128xf32>
    %c0_42 = arith.constant 0 : index
    %c0_43 = arith.constant 0 : index
    %c0_44 = arith.constant 0 : index
    %107 = vector.load %arg5[%c0_42, %c0_43, %c0_44] : memref<1x4x128xf32, #tpu.memory_space<vmem>>, vector<1x4x128xf32>
    tpu.vector_store %arg5[%c0_42, %c0_43, %c0_44], %106 {strides = array<i32>} : memref<1x4x128xf32, #tpu.memory_space<vmem>>, vector<1x4x128xf32>,
    %c0_45 = arith.constant 0 : index
    %c0_46 = arith.constant 0 : index
    %c0_47 = arith.constant 0 : index
    %108 = vector.load %arg6[%c0_45, %c0_46, %c0_47] : memref<1x4x128xf32, #tpu.memory_space<vmem>>, vector<1x4x128xf32>
    %109 = tpu.concatenate %49, %65, %81, %97 in 0 : vector<1x128xf32>, vector<1x128xf32>, vector<1x128xf32>, vector<1x128xf32> -> vector<4x128xf32>
    %110 = vector.shape_cast %109 : vector<4x128xf32> to vector<1x4x128xf32>
    %111 = arith.addf %108, %110 : vector<1x4x128xf32>
    %c0_48 = arith.constant 0 : index
    %c0_49 = arith.constant 0 : index
    %c0_50 = arith.constant 0 : index
    %112 = vector.load %arg6[%c0_48, %c0_49, %c0_50] : memref<1x4x128xf32, #tpu.memory_space<vmem>>, vector<1x4x128xf32>
    tpu.vector_store %arg6[%c0_48, %c0_49, %c0_50], %111 {strides = array<i32>} : memref<1x4x128xf32, #tpu.memory_space<vmem>>, vector<1x4x128xf32>,
    return
  }
  func.func @transform_0(%arg0: i32, %arg1: i32) -> (i32, i32, i32, i32) {
    %c0_i32 = arith.constant 0 : i32
    %c0_i32_0 = arith.constant 0 : i32
    %c0_i32_1 = arith.constant 0 : i32
    return %arg0, %c0_i32, %arg1, %c0_i32_0 : i32, i32, i32, i32
  }
  func.func @transform_1(%arg0: i32, %arg1: i32) -> (i32, i32, i32, i32) {
    %c0_i32 = arith.constant 0 : i32
    %c0_i32_0 = arith.constant 0 : i32
    %c0_i32_1 = arith.constant 0 : i32
    return %arg0, %c0_i32, %arg1, %c0_i32_0 : i32, i32, i32, i32
  }
  func.func @transform_2(%arg0: i32, %arg1: i32) -> (i32, i32, i32) {
    %c0_i32 = arith.constant 0 : i32
    %c0_i32_0 = arith.constant 0 : i32
    %c0_i32_1 = arith.constant 0 : i32
    return %arg0, %c0_i32, %c0_i32_0 : i32, i32, i32
  }
  func.func @transform_3(%arg0: i32, %arg1: i32) -> (i32, i32, i32) {
    %c0_i32 = arith.constant 0 : i32
    %c0_i32_0 = arith.constant 0 : i32
    %c0_i32_1 = arith.constant 0 : i32
    return %arg0, %c0_i32, %c0_i32_0 : i32, i32, i32
  }
  func.func @transform_4(%arg0: i32, %arg1: i32) -> (i32, i32, i32) {
    %c0_i32 = arith.constant 0 : i32
    %c0_i32_0 = arith.constant 0 : i32
    %c0_i32_1 = arith.constant 0 : i32
    return %arg0, %c0_i32, %c0_i32_0 : i32, i32, i32
  }
}

</mosaic_0001>

<bundles_post_ra>
// kernel: tpu_custom_call.1
= control target key start
LH: loop header
LB: loop body
LE: loop exit
PB: predicated region body
PF: predicated region fallthrough
CT: control target
= control target key end

     0   :  { %s1348_s0 = inlined_call_operand.hbm [shape: f32[2,4,2,128], index: 0, kind: input, shape index: {}]   ;;  %s1349_s1 = inlined_call_operand.hbm [shape: s32[2,1,2,128], index: 1, kind: input, shape index: {}]   ;;  %s1350_s2 = inlined_call_operand.hbm [shape: f32[2,4,128], index: 2, kind: output, shape index: {0}]   ;;  %s1351_s3 = inlined_call_operand.hbm [shape: f32[2,4,128], index: 3, kind: output, shape index: {1}]   ;;  %s1352_s4 = inlined_call_operand.hbm [shape: f32[2,4,128], index: 4, kind: output, shape index: {2}]  }
   0x1   :  { %1355 = sst [smem:[#allocation16_spill]] %s1348_s0 }
   0x2   :  { %10 = vsyncpa [#allocation3], 0 }
   0x3   :  { %12 = vsyncpa [#allocation3 + $0x1], 0 }
   0x4   :  { %13 = vsyncpa [#allocation6], 0 }
   0x5   :  { %15 = vsyncpa [#allocation6 + $0x1], 0 }
   0x6   :  { %16 = vsyncpa [#allocation4], 0 }
   0x7   :  { %18 = vsyncpa [#allocation4 + $0x1], 0 }
   0x8   :  { %19 = vsyncpa [#allocation9], 0 }
   0x9   :  { %21 = vsyncpa [#allocation9 + $0x1], 0  ;;  %s1043_s15 = smov 0   ;;  %s1045_s16 = smov 0  }
   0xa   :  { %s1047_s17 = smov 0   ;;  %s1049_s18 = smov 0  }
   0xb   :  { %s1051_s19 = smov 0   ;;  %s1053_s20 = smov 0  }
   0xc LB: > { %s1074_s21 = sadd.s32 4294967295, %s1013_s20   ;;  %s1353_s22 = sadd.s32 4294967294, %s1013_s20   ;;  %s1013_s20 = sphi %s1053_s20, %s27_s20   ;;  %s1009_s19 = sphi %s1051_s19, %s1377_s19   ;;  %s1005_s18 = sphi %s1049_s18, %s1376_s18   ;;  %s1001_s17 = sphi %s1047_s17, %s1375_s17   ;;  %s997_s16 = sphi %s1045_s16, %s1374_s16   ;;  %s993_s15 = sphi %s1043_s15, %s1373_s15  }
   0xd   : > { %s39_s23 = sadd.s32 1, %s1009_s19  ;;  %s48_s24 = sadd.s32 1, %s1001_s17 }
   0xe   : > { %p41_p0 = scmp.ge.s32.totalorder %s39_s23, 2  ;;  %p55_p1 = scmp.ne.s32.totalorder %s1001_s17, %s997_s16 }
   0xf   : > { %p56_p2 = scmp.eq.s32.totalorder %s1013_s20, 0  ;;  %p61_p3 = scmp.ne.s32.totalorder %s997_s16, %s993_s15 }
  0x10   : > { %s1379_s23 = smov (%p41_p0, %s39_s23), 0  ;;  %p62_p5 = scmp.eq.s32.totalorder %s1074_s21, 0 }
  0x11   : > { %1356 = sst [smem:[#allocation15_spill]] %s1379_s23  ;;  %p1086_p4 = por %p56_p2, %p55_p1 }
  0x12   : > { %s43_s26 = ssub.s32 %s1009_s19, %s1379_s23  ;;  %p113_p6 = scmp.eq.s32.totalorder %s1074_s21, 1 }
  0x13   : > { %p46_p7 = scmp.eq.s32.totalorder %s43_s26, 0  ;;  %p1094_p8 = por %p62_p5, %p61_p3 }
  0x14   : > { %p1098_p9 = por %p113_p6, %p55_p1  ;;  %p119_p10 = scmp.eq.s32.totalorder %s1353_s22, 1 }
  0x15   : > { %s1105_s29 = scalar_select %p46_p7, %s1001_s17, %s48_s24  }
  0x16   : > { %p1107_p11 = por %p119_p10, %p61_p3  ;;  %p694_p12 = scmp.ge.s32.totalorder %s1013_s20, 2 }
  0x17   : > { %p742_p13 = scmp.lt.s32.totalorder %s1013_s20, 2  ;;  %s191_s5 = sand.u32 1, %s1001_s17  }
  0x18   : > { %s695_s6 = sshll.u32 %s191_s5, 3  ;;  %s714_s7 = sshll.u32 %s1009_s19, 3 }
  0x19   : > { %s1361_s0 = sld [smem:[#allocation16_spill]]  ;;  %s195_s11 = scalar_lea.vmem [#allocation2], %s695_s6 }
  0x1a   : > { %s204_s12 = sshll.u32 %s195_s11, 4  ;;  %p1120_p0 = pnand %p742_p13, %p1086_p4  ;;  %s205_s12 = int_to_ptr.vmem [resolvable:$true] %s204_s12 }
  0x1b   : > { %p700_p1 = scmp.ge.s32.totalorder %s1013_s20, 1  ;;  %s192_s24 = scalar_lea.sflag [#allocation3], %s191_s5 }
  0x1c   : > { %s1015_s26 = smov 32   ;;  %s1016_s22 = smov 2  }
  0x1d   : > { %p232_p2 = scmp.lt.s32.totalorder %s1013_s20, 3  ;;  %s699_s6 = sshll.u32 %s1009_s19, 1 }
  0x1e   : > { %s223_s25 = scalar_lea.hbm %s1349_s1, %s699_s6  ;;  %s215_s23 = scalar_lea.sflag [#allocation6], %s191_s5 }
  0x1f   : > { %s201_s10 = scalar_lea.hbm %s1361_s0, %s714_s7  ;;  %s698_s7 = sshll.u32 %s191_s5, 1 }
  0x20   : > { %s202_s13 = sshll.u32 %s201_s10, 4  ;;  %p233_p3 = pnand %p700_p1, %p232_p2  ;;  %s203_s13 = int_to_ptr.hbm [resolvable:$true] %s202_s13 }
  0x21   : > { %728 = dma.hbm_to_vmem [thread:$0]  (!%p1120_p0), %s203_s13, 128, %s205_s12, %s192_s24, %s1015_s26, %s1015_s26, %s1016_s22  }
  0x22   : > { %s218_s10 = scalar_lea.vmem [#allocation5], %s698_s7  ;;  %s225_s0 = sshll.u32 %s223_s25, 4  ;;  %s226_s0 = int_to_ptr.hbm [resolvable:$true] %s225_s0 }
  0x23   : > { %s227_s11 = sshll.u32 %s218_s10, 4  ;;  %236 = sbr.rel (%p233_p3) target bundleno = 131 (0x83), region = 28  ;;  %s228_s11 = int_to_ptr.vmem [resolvable:$true] %s227_s11 }
  0x24   : > { %731 = dma.hbm_to_vmem [thread:$0]  (!%p1120_p0), %s226_s0, 32, %s228_s11, %s215_s23  }
  0x25   : > { %s1135_s22 = sand.u32 (!%p233_p3), 1, %s997_s16  }
  0x26   : > { %s701_s12 = sshll.u32 (!%p233_p3), %s1135_s22, 3  ;;  %s239_s13 = scalar_lea.sflag (!%p233_p3), [#allocation3], %s1135_s22 }
  0x27   : > { %s242_s24 = scalar_lea.vmem (!%p233_p3), [#allocation2], %s701_s12 }
  0x28   : > { %976 = dma.done.wait (%p1094_p8), %s239_s13, 128  }
  0x29   : > { %978 = vsyncadd (%p1094_p8), %s239_s13, 4294967168  ;;  %s702_s5 = sshll.u32 %s1135_s22, 1  ;;  %s249_s0 = scalar_lea.sflag [#allocation6], %s1135_s22 }
  0x2a   : > { %s252_s23 = scalar_lea.vmem [#allocation5], %s702_s5 }
  0x2b   : > { %980 = dma.done.wait (%p1094_p8), %s249_s0, 32  }
  0x2c   : > { %982 = vsyncadd (%p1094_p8), %s249_s0, 4294967264  ;;  %s703_s14 = sshll.u32 %s1135_s22, 2  ;;  %v1017_v0 = vmov 0.0   ;;  %v300_v1 = vld [vmem:[%s242_s24] sm:$0x3]  ;;  %vm342_vm7 = vcmask 1041408  }
  0x2d   : > { %s1150_s26 = scalar_lea.vmem [#allocation8], %s703_s14  ;;  %s1153_s7 = scalar_lea.vmem [#allocation7], %s703_s14  ;;  %v301_v2 = vld [vmem:[%s242_s24 + $0x2] sm:$0x3]  ;;  %v302_v3 = vld [vmem:[%s242_s24 + $0x4] sm:$0x3] }
  0x2e   : > { %298 = vst [vmem:[%s1150_s26] sm:$0xf] %v1017_v0  ;;  %s1156_s6 = scalar_lea.vmem [#allocation10], %s703_s14  ;;  %v305_v4 = vmax.f32 %v300_v1, %v301_v2  ;;  %v303_v5 = vld [vmem:[%s242_s24 + $0x6] sm:$0x3]  ;;  %v304_v7 = vld [vmem:[%s252_s23] sm:$0x3] }
  0x2f   : > { %297 = vst [vmem:[%s1153_s7] sm:$0xf] %v1017_v0  ;;  %vm340_vm0 = vcmp.ne.s32.totalorder %v304_v7, 4294967295  ;;  %vm350_vm1 = vcmp.eq.s32.totalorder %v304_v7, 0  ;;  %vm377_vm2 = vcmp.eq.s32.totalorder %v304_v7, 1  ;;  %vm404_vm3 = vcmp.eq.s32.totalorder %v304_v7, 2  ;;  %s1239_s27 = sshll.u32 %s1005_s18, 2 }
  0x30   : > { %299 = vst [vmem:[%s1156_s6] sm:$0xf] %v1017_v0  ;;  %v306_v6 = vmax.f32 %v305_v4, %v302_v3  ;;  %vm1172_vm4 = vmand %vm350_vm1, %vm340_vm0  ;;  %vm431_vm5 = vcmp.eq.s32.totalorder %v304_v7, 3  ;;  %vm451_vm10 = vcmask 1040384   ;;  %vm454_vm11 = vcmask 1042432   ;;  %s505_s9 = scalar_lea.hbm %s1351_s3, %s1239_s27  ;;  %s519_s11 = scalar_lea.hbm %s1352_s4, %s1239_s27 }
  0x31   : > { %vm1177_vm6 = vmand %vm377_vm2, %vm340_vm0  ;;  %v361_v21 = vsel %vm1172_vm4, 1.0, %v1017_v0  ;;  %s475_s12 = sand.u32 1, %s1074_s21   ;;  %s507_s13 = sshll.u32 %s1150_s26, 4  ;;  %s508_s13 = int_to_ptr.vmem [resolvable:$true] %s507_s13 }
  0x32   : > { %v307_v8 = vmax.f32 %v306_v6, %v303_v5  ;;  %vm1182_vm8 = vmand %vm404_vm3, %vm340_vm0  ;;  %v388_v22 = vsel %vm1177_vm6, 1.0, %v1017_v0  ;;  %v362_v24 = vsel %vm342_vm7, %v361_v21, 0.0  ;;  %s1261_s24 = sshll.u32 %s505_s9, 4  ;;  %s521_s5 = sshll.u32 %s1156_s6, 4  ;;  %s510_s24 = int_to_ptr.hbm [resolvable:$true] %s1261_s24  ;;  %s1269_s5 = int_to_ptr.vmem [resolvable:$true] %s521_s5 }
  0x33   : > { %vm1187_vm9 = vmand %vm431_vm5, %vm340_vm0  ;;  %v389_v25 = vsel %vm342_vm7, %v388_v22, 0.0  ;;  %v363_v27 = vrot.slane %v362_v24, 4  ;;  %v415_v29 = vsel %vm1182_vm8, 1.0, %v1017_v0  ;;  %s1265_s0 = sshll.u32 %s519_s11, 4  ;;  %s1273_s21 = scalar_lea.sflag [#allocation9], %s475_s12  ;;  %s524_s0 = int_to_ptr.hbm [resolvable:$true] %s1265_s0 }
  0x34   : > { %v1159_v9 = vsub.f32 %v300_v1, %v307_v8  ;;  %v1161_v10 = vsub.f32 %v301_v2, %v307_v8  ;;  %v1163_v11 = vsub.f32 %v302_v3, %v307_v8  ;;  %v1165_v12 = vsub.f32 %v303_v5, %v307_v8  ;;  %s881_s23 = sshra.s32 %s510_s24, 4  ;;  %s887_s8 = scalar_lea.hbm %s1351_s3, 8  ;;  %s882_s23 = int_to_ptr.hbm [resolvable:$true] %s881_s23 }
  0x35   : > { %v390_v28 = vrot.slane %v389_v25, 4  ;;  %v442_v30 = vsel %vm1187_vm9, 1.0, %v1017_v0  ;;  %v416_v33 = vsel %vm342_vm7, %v415_v29, 0.0  ;;  %v364_v36 = vadd.f32 %v363_v27, %v362_v24  ;;  %s883_s14 = scalar_lea.hbm %s882_s23, 4  ;;  %p888_p7 = scmp.lt.s32.totalorder %s882_s23, %s1351_s3 }
  0x36   : > { %v312_v13 = vmul.f32 1.442695, %v1159_v9  ;;  %v314_v14 = vmul.f32 1.442695, %v1161_v10  ;;  %v316_v15 = vmul.f32 1.442695, %v1163_v11  ;;  %p884_p4 = scmp.ne.s32.totalorder %s882_s23, %s883_s14  ;;  %p889_p8 = scmp.lt.s32.totalorder %s887_s8, %s883_s14 }
  0x37   : > { %v318_v16 = vmul.f32 1.442695, %v1165_v12  ;;  %v443_v34 = vsel %vm342_vm7, %v442_v30, 0.0  ;;  %v391_v37 = vadd.f32 %v390_v28, %v389_v25  ;;  %v417_v38 = vrot.slane %v416_v33, 4  ;;  %v464_v0 = vld [vmem:[%s1156_s6] sm:$0xf] }
  0x38   : > { %795 = vpow2.f32 %v312_v13  ;;  %v444_v39 = vrot.slane %v443_v34, 4  ;;  %v365_v41 = vrot.slane %v364_v36, 2  ;;  %p885_p5 = pnand %p884_p4, %p1098_p9  ;;  %p890_p10 = por %p889_p8, %p888_p7 }
  0x39   : > { %797 = vpow2.f32 %v314_v14  ;;  %v392_v42 = vrot.slane %v391_v37, 2  ;;  %v418_v43 = vadd.f32 %v417_v38, %v416_v33 }
  0x3a   : > { %799 = vpow2.f32 %v316_v15  ;;  %v445_v44 = vadd.f32 %v444_v39, %v443_v34  ;;  %v366_v46 = vadd.f32 %v365_v41, %v364_v36  ;;  %p886_p6 = pneg %p885_p5 }
  0x3b   : > { %801 = vpow2.f32 %v318_v16  ;;  %v393_v47 = vadd.f32 %v392_v42, %v391_v37  ;;  %v419_v48 = vrot.slane %v418_v43, 2 }
  0x3c   : > { %v446_v49 = vrot.slane %v445_v44, 2  ;;  %v367_v50 = vrot.slane %v366_v46, 1  ;;  %p891_p13 = pnand %p890_p10, %p886_p6 }
  0x3d   : > { %v394_v51 = vrot.slane %v393_v47, 1  ;;  %v420_v52 = vadd.f32 %v419_v48, %v418_v43 }
  0x3e   : > { %v1195_v23 = vpop.eup %795  ;;  %v447_v53 = vadd.f32 %v446_v49, %v445_v44  ;;  %v368_v54 = vadd.f32 %v367_v50, %v366_v46 }
  0x3f   : > { %v1199_v26 = vpop.eup %797  ;;  %v395_v55 = vadd.f32 %v394_v51, %v393_v47  ;;  %v421_v56 = vrot.slane %v420_v52, 1 }
  0x40   : > { %v1205_v31 = vpop.eup %799  ;;  %v320_v32 = vadd.f32 %v1199_v26, %v1195_v23  ;;  %v448_v57 = vrot.slane %v447_v53, 1 }
  0x41   : > { %v1211_v35 = vpop.eup %801  ;;  %v422_v58 = vadd.f32 %v421_v56, %v420_v52  ;;  %v465_v59 = vsel %vm451_vm10, %v368_v54, %v395_v55 }
  0x42   : > { %v321_v40 = vadd.f32 %v1205_v31, %v320_v32  ;;  %v449_v61 = vadd.f32 %v448_v57, %v447_v53 }
  0x43   : > { %v466_v1 = vsel %vm342_vm7, %v465_v59, %v422_v58 }
  0x44   : > { %v322_v45 = vadd.f32 %v1211_v35, %v321_v40  ;;  %v467_v3 = vsel %vm454_vm11, %v466_v1, %v449_v61  ;;  %v458_v61 = vld [vmem:[%s1150_s26] sm:$0xf] }
  0x45   : > { %v468_v5 = vadd.f32 %v467_v3, %v464_v0 }
  0x46   : > { %803 = vrcp.f32 %v322_v45  ;;  %vm328_vm12 = vweird.f32 %v322_v45  ;;  %v332_v15 = vand.u32 2147483647, %v322_v45  ;;  %v334_v16 = vand.u32 2147483648, %v322_v45 }
  0x47   : > { %805 = vlog2.f32 %v322_v45  ;;  %469 = vst [vmem:[%s1156_s6] sm:$0xf] %v468_v5 }
  0x48   : > { %vm333_vm15 = vcmp.eq.f32.partialorder %v332_v15, 8.507059e+37  ;;  %v335_v19 = vor.u32 1.1754944e-38, %v334_v16 }
  0x4c   : > { %v804_v60 = vpop.eup %803 }
  0x4d   : > { %v806_v62 = vpop.eup %805  ;;  %v324_v63 = vmul.f32 %v804_v60, %v322_v45  ;;  %vm329_vm13 = vweird.f32 %v804_v60 }
  0x4e   : > { %v339_v2 = vmul.f32 0.6931472, %v806_v62  ;;  %vm330_vm14 = vmor %vm328_vm12, %vm329_vm13 }
  0x4f   : > { %v325_v4 = vsub.f32 1.0, %v324_v63 }
  0x50   : > { %v352_v6 = vsub.f32 %v339_v2, %v1159_v9  ;;  %v379_v7 = vsub.f32 %v339_v2, %v1161_v10  ;;  %v406_v8 = vsub.f32 %v339_v2, %v1163_v11  ;;  %v433_v13 = vsub.f32 %v339_v2, %v1165_v12 }
  0x51   : > { %v326_v14 = vmul.f32 %v804_v60, %v325_v4 }
  0x52   : > { %v353_v21 = vsel %vm1172_vm4, %v352_v6, 0.0  ;;  %v380_v22 = vsel %vm1177_vm6, %v379_v7, 0.0  ;;  %v407_v9 = vsel %vm1182_vm8, %v406_v8, 0.0  ;;  %v434_v10 = vsel %vm1187_vm9, %v433_v13, 0.0 }
  0x53   : > { %v354_v11 = vsel %vm342_vm7, %v353_v21, 0.0  ;;  %v381_v12 = vsel %vm342_vm7, %v380_v22, 0.0  ;;  %v408_v24 = vsel %vm342_vm7, %v407_v9, 0.0  ;;  %v435_v25 = vsel %vm342_vm7, %v434_v10, 0.0 }
  0x54   : > { %v355_v27 = vrot.slane %v354_v11, 4  ;;  %v382_v17 = vrot.slane %v381_v12, 4  ;;  %v409_v28 = vrot.slane %v408_v24, 4  ;;  %v436_v29 = vrot.slane %v435_v25, 4 }
  0x55   : > { %v327_v18 = vadd.f32 %v804_v60, %v326_v14 }
  0x56   : > { %v356_v20 = vadd.f32 %v355_v27, %v354_v11  ;;  %v383_v30 = vadd.f32 %v382_v17, %v381_v12  ;;  %v410_v32 = vadd.f32 %v409_v28, %v408_v24  ;;  %v437_v33 = vadd.f32 %v436_v29, %v435_v25 }
  0x57   : > { %v331_v34 = vsel %vm330_vm14, %v804_v60, %v327_v18 }
  0x58   : > { %v357_v36 = vrot.slane %v356_v20, 2  ;;  %v384_v37 = vrot.slane %v383_v30, 2  ;;  %v411_v38 = vrot.slane %v410_v32, 2  ;;  %v438_v39 = vrot.slane %v437_v33, 2 }
  0x59   : > { %v336_v40 = vsel %vm333_vm15, %v335_v19, %v331_v34 }
  0x5a   : > { %v358_v41 = vadd.f32 %v357_v36, %v356_v20  ;;  %v385_v42 = vadd.f32 %v384_v37, %v383_v30  ;;  %v412_v43 = vadd.f32 %v411_v38, %v410_v32  ;;  %v439_v44 = vadd.f32 %v438_v39, %v437_v33 }
  0x5b   : > { %v341_v45 = vmul.f32 %v1195_v23, %v336_v40  ;;  %v369_v46 = vmul.f32 %v1199_v26, %v336_v40  ;;  %v396_v47 = vmul.f32 %v1205_v31, %v336_v40  ;;  %v423_v48 = vmul.f32 %v1211_v35, %v336_v40 }
  0x5c   : > { %v359_v49 = vrot.slane %v358_v41, 1  ;;  %v386_v50 = vrot.slane %v385_v42, 1  ;;  %v413_v51 = vrot.slane %v412_v43, 1  ;;  %v440_v52 = vrot.slane %v439_v44, 1 }
  0x5d   : > { %v343_v53 = vsel %vm342_vm7, %v341_v45, 0.0  ;;  %v370_v54 = vsel %vm342_vm7, %v369_v46, 0.0  ;;  %v397_v23 = vsel %vm342_vm7, %v396_v47, 0.0  ;;  %v424_v26 = vsel %vm342_vm7, %v423_v48, 0.0 }
  0x5e   : > { %v360_v31 = vadd.f32 %v359_v49, %v358_v41  ;;  %v387_v35 = vadd.f32 %v386_v50, %v385_v42  ;;  %v414_v55 = vadd.f32 %v413_v51, %v412_v43  ;;  %v441_v56 = vadd.f32 %v440_v52, %v439_v44 }
  0x5f   : > { %v344_v57 = vrot.slane %v343_v53, 4  ;;  %v371_v58 = vrot.slane %v370_v54, 4  ;;  %v398_v59 = vrot.slane %v397_v23, 4  ;;  %v425_v60 = vrot.slane %v424_v26, 4 }
  0x60   : > { %v459_v62 = vsel %vm451_vm10, %v360_v31, %v387_v35 }
  0x61   : > { %v460_v63 = vsel %vm342_vm7, %v459_v62, %v414_v55  ;;  %v345_v0 = vadd.f32 %v344_v57, %v343_v53  ;;  %v372_v1 = vadd.f32 %v371_v58, %v370_v54  ;;  %v399_v2 = vadd.f32 %v398_v59, %v397_v23 }
  0x62   : > { %v461_v3 = vsel %vm454_vm11, %v460_v63, %v441_v56  ;;  %v426_v4 = vadd.f32 %v425_v60, %v424_v26 }
  0x63   : > { %v462_v5 = vadd.f32 %v461_v3, %v458_v61  ;;  %v346_v6 = vrot.slane %v345_v0, 2  ;;  %v373_v7 = vrot.slane %v372_v1, 2  ;;  %v400_v8 = vrot.slane %v399_v2, 2 }
  0x64   : > { %v427_v13 = vrot.slane %v426_v4, 2 }
  0x65   : > { %463 = vst [vmem:[%s1150_s26] sm:$0xf] %v462_v5  ;;  %v347_v14 = vadd.f32 %v346_v6, %v345_v0  ;;  %v374_v15 = vadd.f32 %v373_v7, %v372_v1  ;;  %v401_v16 = vadd.f32 %v400_v8, %v399_v2 }
  0x66   : > { %v428_v21 = vadd.f32 %v427_v13, %v426_v4 }
  0x67   : > { %894 = shalt.err (!%p891_p13)
}
  0x68   : > { %720 = dma.vmem_to_hbm [thread:$0]  (%p1098_p9), %s508_s13, 64, %s510_s24, %s1273_s21   ;;  %v348_v22 = vrot.slane %v347_v14, 1  ;;  %v375_v9 = vrot.slane %v374_v15, 1  ;;  %v402_v10 = vrot.slane %v401_v16, 1 }
  0x69   : > { %s909_s26 = sshra.s32 %s524_s0, 4  ;;  %s915_s23 = scalar_lea.hbm %s1352_s4, 8  ;;  %s910_s26 = int_to_ptr.hbm [resolvable:$true] %s909_s26 }
  0x6a   : > { %s911_s10 = scalar_lea.hbm %s910_s26, 4  ;;  %p916_p3 = scmp.lt.s32.totalorder %s910_s26, %s1352_s4 }
  0x6b   : > { %p912_p0 = scmp.ne.s32.totalorder %s910_s26, %s911_s10  ;;  %p917_p4 = scmp.lt.s32.totalorder %s915_s23, %s911_s10 }
  0x6d   : > { %p913_p1 = pnand %p912_p0, %p1098_p9  ;;  %p918_p5 = por %p917_p4, %p916_p3 }
  0x6f   : > { %p914_p2 = pneg %p913_p1 }
  0x71   : > { %p919_p6 = pnand %p918_p5, %p914_p2 }
  0x73   : > { %922 = shalt.err (!%p919_p6)
}
  0x74   : > { %721 = dma.vmem_to_hbm [thread:$0]  (%p1098_p9), %s1269_s5, 64, %s524_s0, %s1273_s21   ;;  %v429_v11 = vrot.slane %v428_v21, 1  ;;  %v349_v12 = vadd.f32 %v348_v22, %v347_v14  ;;  %v376_v24 = vadd.f32 %v375_v9, %v374_v15  ;;  %v403_v25 = vadd.f32 %v402_v10, %v401_v16  ;;  %v450_v17 = vld [vmem:[%s1153_s7] sm:$0xf] }
  0x75   : > { %s491_s18 = scalar_lea.hbm %s1350_s2, %s1239_s27  ;;  %s493_s8 = sshll.u32 %s1153_s7, 4  ;;  %s494_s8 = int_to_ptr.vmem [resolvable:$true] %s493_s8 }
  0x76   : > { %v430_v27 = vadd.f32 %v429_v11, %v428_v21  ;;  %v452_v28 = vsel %vm451_vm10, %v349_v12, %v376_v24  ;;  %s495_s9 = sshll.u32 %s491_s18, 4  ;;  %s471_s5 = scalar_lea.sflag [#allocation4], %s1135_s22  ;;  %s496_s9 = int_to_ptr.hbm [resolvable:$true] %s495_s9 }
  0x77   : > { %v453_v29 = vsel %vm342_vm7, %v452_v28, %v403_v25  ;;  %s937_s27 = sshra.s32 %s496_s9, 4  ;;  %s943_s26 = scalar_lea.hbm %s1350_s2, 8  ;;  %s938_s27 = int_to_ptr.hbm [resolvable:$true] %s937_s27 }
  0x78   : > { %v455_v18 = vsel %vm454_vm11, %v453_v29, %v430_v27  ;;  %s939_s0 = scalar_lea.hbm %s938_s27, 4  ;;  %p944_p13 = scmp.lt.s32.totalorder %s938_s27, %s1350_s2 }
  0x79   : > { %v456_v19 = vadd.f32 %v455_v18, %v450_v17  ;;  %p940_p7 = scmp.ne.s32.totalorder %s938_s27, %s939_s0  ;;  %p945_p0 = scmp.lt.s32.totalorder %s943_s26, %s939_s0 }
  0x7b   : > { %457 = vst [vmem:[%s1153_s7] sm:$0xf] %v456_v19  ;;  %p941_p8 = pnand %p940_p7, %p1098_p9  ;;  %p946_p1 = por %p945_p0, %p944_p13 }
  0x7d   : > { %p942_p10 = pneg %p941_p8 }
  0x7f   : > { %p947_p2 = pnand %p946_p1, %p942_p10 }
  0x81   : > { %950 = shalt.err (!%p947_p2)
}
  0x82   : > { %719 = dma.vmem_to_hbm [thread:$0]  (%p1098_p9), %s494_s8, 64, %s496_s9, %s471_s5  }
  0x83 PF: > { %s535_s22 = sand.u32 1, %s993_s15   ;;  %p733_p3 = pnand %p694_p12, %p1107_p11 }
  0x84   : > { %s536_s7 = scalar_lea.sflag [#allocation4], %s535_s22 }
  0x85   : > { %p734_p4 = pneg %p733_p3 }
  0x87   : > { %984 = dma.done.wait (%p734_p4), %s536_s7, 64  }
  0x88   : > { %986 = vsyncadd (%p734_p4), %s536_s7, 4294967232  ;;  %s1371_s12 = sadd.s32 4294967294, %s1013_s20  }
  0x89   : > { %s545_s23 = sand.u32 1, %s1371_s12  }
  0x8a   : > { %s546_s14 = scalar_lea.sflag [#allocation9], %s545_s23 }
  0x8b   : > { %988 = dma.done.wait (%p734_p4), %s546_s14, 128  }
  0x8c   : > { %990 = vsyncadd (%p734_p4), %s546_s14, 4294967168  ;;  %s27_s20 = sadd.s32 1, %s1013_s20   ;;  %s1372_s28 = sld [smem:[#allocation15_spill]] }
  0x8d   : > { %p24_p9 = scmp.ge.s32.totalorder %s27_s20, 4   ;;  %s1373_s15 = smov %s997_s16 }
  0x8e   : > { %s1374_s16 = smov %s1001_s17  ;;  %s1375_s17 = smov %s1105_s29 }
  0x8f   : > { %s1376_s18 = smov %s1009_s19  ;;  %26 = sbr.rel (!%p24_p9) target bundleno = 12 (0xc), region = 122 }
  0x92   : > { %s1377_s19 = smov %s1372_s28 }
  0x94   :  { %562 = vsyncpa [#allocation3], 1 }
  0x95   :  { %564 = vsyncpa [#allocation3 + $0x1], 1 }
  0x96   :  { %565 = vsyncpa [#allocation6], 1 }
  0x97   :  { %567 = vsyncpa [#allocation6 + $0x1], 1 }
  0x98   :  { %568 = vsyncpa [#allocation4], 1 }
  0x99   :  { %570 = vsyncpa [#allocation4 + $0x1], 1 }
  0x9a   :  { %571 = vsyncpa [#allocation9], 1 }
  0x9b   :  { %573 = vsyncpa [#allocation9 + $0x1], 1 }

</bundles_post_ra>
